<compile_context>
chip_gen: v7x
topology: tpu7x:2x2x1
jax: 0.10.0
libtpu: 0.0.40
codegen_flags: <defaults>
</compile_context>

<pallas_src>
import jax
import jax.numpy as jnp
import numpy as np
from jax.experimental import pallas as pl
from jax.experimental.pallas import tpu as pltpu

NEG_FILL = -1e30   # stands in for float('-inf') in the band logits
EPS = 1e-7         # SimplifiedLayerNorm eps


# ----------------------------------------------------------------------------
# Pallas kernel: one grid step = Bt batch elements, all heads fused.
# ----------------------------------------------------------------------------
def _rpe_kernel(p_ref, seg_ref, x_ref, out_ref):
    # p_ref  : (H*(T+1), T+1)      bf16 -- band-softmax probs, batch-invariant,
    #                                      resident across steps (const index_map)
    # seg_ref: (N, N)              bf16 -- block-diagonal per-batch segment matrix
    # x_ref  : (1, T+1, N)         f32  -- X_tilde, Bt batches stacked into lanes
    # out_ref: (1, (H+1)*(T+1), N) f32  -- row slabs [X_tilde; v_0; ...; v_{H-1}]
    HT, Tp1 = p_ref.shape

    xt = x_ref[0]                                   # (Tp1, N), lane-dense load
    out_ref[0, 0:Tp1, :] = xt                       # slab 0: X_tilde passthrough

    # All H heads x all Bt fused batches in ONE MXU matmul (bf16 in, f32 acc).
    v = jnp.dot(p_ref[...], xt.astype(jnp.bfloat16),
                preferred_element_type=jnp.float32)             # (H*Tp1, N)

    # SimplifiedLayerNorm: per-(row, batch) L2 norm over each batch's D lanes,
    # via a block-diagonal matmul so the sums are already lane-broadcast
    # (no in-kernel reshapes, stays lane-dense).  Exact divide.
    ssq = jnp.dot((v * v).astype(jnp.bfloat16), seg_ref[...],
                  preferred_element_type=jnp.float32)           # (H*Tp1, N)
    out_ref[0, Tp1:, :] = v / (jnp.sqrt(ssq) + EPS)             # one lane-dense store


# ----------------------------------------------------------------------------
# Wrapper: parameter-only precompute + layout plumbing + single pallas_call.
# ----------------------------------------------------------------------------
def make_rpe_params(T, H, w_plus, w_minus):
    """W = ones(T, H) * w_minus with the main diagonal filled with w_plus."""
    W = jnp.full((T, H), w_minus, dtype=jnp.float32)
    d = min(T, H)
    W = W.at[jnp.arange(d), jnp.arange(d)].set(w_plus)
    return W


def _band_softmax_probs(W):
    """Banded softmax probabilities for all heads, stacked along rows.

    Head h, query i, key k: logit = W[i-k-1, h] iff (i-k-1) in [h, h+H-1],
    else -inf; softmax over k; all-masked rows -> zero probabilities
    (matches torch nan_to_num semantics).  Parameter-only: computed once per
    call in the wrapper, never per grid step.
    """
    T, H = W.shape
    Tp1 = T + 1
    off = jnp.arange(Tp1)[:, None] - jnp.arange(Tp1)[None, :]        # i - k
    idx = jnp.clip(off - 1, 0, T - 1)
    probs = []
    for h in range(H):
        valid = jnp.logical_and(off >= h + 1, off <= h + H)
        logits = jnp.where(valid, W[idx, h], NEG_FILL)
        m = jnp.max(logits, axis=-1, keepdims=True)
        e = jnp.where(valid, jnp.exp(logits - m), 0.0)
        den = jnp.sum(e, axis=-1, keepdims=True)
        probs.append(jnp.where(den > 0.0, e / jnp.maximum(den, 1e-30), 0.0))
    return jnp.concatenate(probs, axis=0)                            # (H*Tp1, Tp1)


def _choose_bt(B, D):
    """Largest batch tile with Bt*D <= 256 MXU columns and grid length >= 2."""
    divs = [d for d in range(1, B + 1) if B % d == 0]
    ok = [d for d in divs if d * D <= 256 and B // d >= 2]
    if ok:
        return max(ok)
    ok = [d for d in divs if d * D <= 256]
    return max(ok) if ok else 1


def simplified_rpe_attention(X, W, Bt=None):
    """X: (B, T, D), W: (T, H)  ->  V: (B, T+1, (H+1)*D), matches PyTorch."""
    B, T, D = X.shape
    T_w, H = W.shape
    assert T_w == T
    # The PyTorch module indexes W[j + h, h] for j, h in [0, H); keep in range.
    assert 2 * H - 1 <= T, "need 2*H - 1 <= T so band offsets index into W"
    Tp1 = T + 1
    if Bt is None:
        Bt = _choose_bt(B, D)
    assert B % Bt == 0
    G = B // Bt
    N = Bt * D

    # Batch-invariant precompute (parameter-only), held resident in VMEM.
    p_all = _band_softmax_probs(W).astype(jnp.bfloat16)              # (H*Tp1, Tp1)
    lane_seg = jnp.arange(N) // D
    seg = (lane_seg[:, None] == lane_seg[None, :]).astype(jnp.bfloat16)  # (N, N)

    # Layout plumbing (cheap, wrapper-side): append the zero row (-> X_tilde)
    # and stack Bt batch elements into the lane dimension.
    x_tilde = jnp.concatenate([X, jnp.zeros((B, 1, D), X.dtype)], axis=1)
    x_lanes = x_tilde.reshape(G, Bt, Tp1, D).transpose(0, 2, 1, 3).reshape(G, Tp1, N)

    out = pl.pallas_call(
        _rpe_kernel,
        out_shape=jax.ShapeDtypeStruct((G, (H + 1) * Tp1, N), jnp.float32),
        grid_spec=pltpu.PrefetchScalarGridSpec(
            num_scalar_prefetch=0,
            grid=(G,),
            in_specs=[
                pl.BlockSpec((H * Tp1, Tp1), lambda g: (0, 0)),      # p_all: resident
                pl.BlockSpec((N, N), lambda g: (0, 0)),              # seg:   resident
                pl.BlockSpec((1, Tp1, N), lambda g: (g, 0, 0)),      # X_tilde lanes
            ],
            out_specs=pl.BlockSpec((1, (H + 1) * Tp1, N), lambda g: (g, 0, 0)),
        ),
        compiler_params=pltpu.CompilerParams(
            dimension_semantics=("parallel",)),   # grid steps split across TCs on v7x
    )(p_all, seg, x_lanes)

    # Un-plumb the lane-stacked slabs into the module's (B, T+1, (H+1)*D).
    out = out.reshape(G, H + 1, Tp1, Bt, D).transpose(0, 3, 2, 1, 4)
    return out.reshape(B, Tp1, (H + 1) * D)


# ----------------------------------------------------------------------------
# Pure-JAX f32 reference (mirrors the PyTorch code literally) for verification.
# ----------------------------------------------------------------------------
def reference(X, W):
    B, T, D = X.shape
    H = W.shape[1]
    Tp1 = T + 1
    x_tilde = jnp.concatenate([X, jnp.zeros_like(X[..., :1, :])], axis=-2)
    outs = [x_tilde]
    for h in range(H):
        Wh = jnp.full((Tp1, Tp1), -jnp.inf, dtype=jnp.float32)
        for j in range(H):
            off = j + h + 1
            idx = jnp.arange(Tp1 - off)
            Wh = Wh.at[idx + off, idx].set(W[j + h, h])
        m = jnp.max(Wh, axis=-1, keepdims=True)
        e = jnp.exp(Wh - m)
        p = e / jnp.sum(e, axis=-1, keepdims=True)
        p = jnp.nan_to_num(p, nan=0.0)      # all -inf rows -> 0 probs
        v = jnp.matmul(p, x_tilde, precision=jax.lax.Precision.HIGHEST)
        norm = jnp.linalg.norm(v, axis=-1, keepdims=True)
        outs.append(v / (norm + EPS))
    return jnp.concatenate(outs, axis=-1)


if __name__ == "__main__":
    # Small shapes consistent with the module: T=15 tokens, D=32 features,
    # H=2 heads.  B=8 so the kernel fuses Bt=4 batches per step (Bt*D = 128
    # MXU columns) while keeping a 2-step "parallel" grid.  Output (8, 16, 96).
    B, T, D, H = 8, 15, 32, 2
    w_plus, w_minus = 2.0, 0.5

    key = jax.random.PRNGKey(0)
    X = jax.random.normal(key, (B, T, D), dtype=jnp.float32)
    W = make_rpe_params(T, H, w_plus, w_minus)

    V = jax.jit(simplified_rpe_attention)(X, W)
    jax.block_until_ready(V)

    V_ref = reference(X, W)
    assert V.shape == (B, T + 1, (H + 1) * D), V.shape
    # Kernel uses explicit bf16 MXU operands (f32 accumulation); compare to the
    # exact-f32 reference at bf16-matmul tolerance.
    np.testing.assert_allclose(np.asarray(V), np.asarray(V_ref),
                               rtol=2e-2, atol=1e-2)
    print("KERNEL_OK")
</pallas_src>

<mosaic_0001>
module attributes {stable_mosaic.version = 11 : i64} {
  func.func @_rpe_kernel(%arg0: i32, %arg1: memref<32x16xbf16, #tpu.memory_space<vmem>>, %arg2: memref<128x128xbf16, #tpu.memory_space<vmem>>, %arg3: memref<1x16x128xf32, #tpu.memory_space<vmem>>, %arg4: memref<1x48x128xf32, #tpu.memory_space<vmem>>) attributes {dimension_semantics = [#tpu.dimension_semantics<parallel>], iteration_bounds = array<i64: 2>, scalar_prefetch = 0 : i64, scratch_operands = 0 : i64, tpu.core_type = #tpu.core_type<tc>, window_params = [{pipeline_mode = #tpu.pipeline_mode<synchronous>, transform_indices = @transform_0, window_bounds = array<i64: 32, 16>}, {pipeline_mode = #tpu.pipeline_mode<synchronous>, transform_indices = @transform_1, window_bounds = array<i64: 128, 128>}, {transform_indices = @transform_2, window_bounds = array<i64: 1, 16, 128>}, {transform_indices = @transform_3, window_bounds = array<i64: 1, 48, 128>}]} {
    %c0 = arith.constant 0 : index
    %c0_0 = arith.constant 0 : index
    %c0_1 = arith.constant 0 : index
    %0 = vector.load %arg3[%c0, %c0_0, %c0_1] : memref<1x16x128xf32, #tpu.memory_space<vmem>>, vector<1x16x128xf32>
    %1 = vector.shape_cast %0 : vector<1x16x128xf32> to vector<16x128xf32>
    %c0_2 = arith.constant 0 : index
    %c0_3 = arith.constant 0 : index
    %c0_4 = arith.constant 0 : index
    %2 = vector.load %arg4[%c0_2, %c0_3, %c0_4] : memref<1x48x128xf32, #tpu.memory_space<vmem>>, vector<1x16x128xf32>
    %3 = vector.shape_cast %2 : vector<1x16x128xf32> to vector<16x128xf32>
    %4 = vector.shape_cast %1 : vector<16x128xf32> to vector<1x16x128xf32>
    tpu.vector_store %arg4[%c0_2, %c0_3, %c0_4], %4 {strides = array<i32>} : memref<1x48x128xf32, #tpu.memory_space<vmem>>, vector<1x16x128xf32>,
    %c0_5 = arith.constant 0 : index
    %c0_6 = arith.constant 0 : index
    %5 = vector.load %arg1[%c0_5, %c0_6] : memref<32x16xbf16, #tpu.memory_space<vmem>>, vector<32x16xbf16>
    %6 = arith.truncf %1 : vector<16x128xf32> to vector<16x128xbf16>
    %cst = arith.constant dense<0.000000e+00> : vector<32x128xf32>
    %7 = tpu.matmul %5, %6, %cst {dimension_numbers = #tpu.dot_dimension_numbers<[1], [0], [0], [1], [0, 0, 1, 1], [], []>} : vector<32x16xbf16>, vector<16x128xbf16>, vector<32x128xf32> -> vector<32x128xf32>
    %8 = arith.mulf %7, %7 : vector<32x128xf32>
    %9 = arith.truncf %8 : vector<32x128xf32> to vector<32x128xbf16>
    %c0_7 = arith.constant 0 : index
    %c0_8 = arith.constant 0 : index
    %10 = vector.load %arg2[%c0_7, %c0_8] : memref<128x128xbf16, #tpu.memory_space<vmem>>, vector<128x128xbf16>
    %cst_9 = arith.constant dense<0.000000e+00> : vector<32x128xf32>
    %11 = tpu.matmul %9, %10, %cst_9 {dimension_numbers = #tpu.dot_dimension_numbers<[1], [0], [0], [1], [0, 0, 1, 1], [], []>} : vector<32x128xbf16>, vector<128x128xbf16>, vector<32x128xf32> -> vector<32x128xf32>
    %12 = math.sqrt %11 : vector<32x128xf32>
    %cst_10 = arith.constant 1.000000e-07 : f32
    %13 = vector.broadcast %cst_10 : f32 to vector<32x128xf32>
    %14 = arith.addf %12, %13 : vector<32x128xf32>
    %15 = arith.divf %7, %14 : vector<32x128xf32>
    %c0_11 = arith.constant 0 : index
    %c16 = arith.constant 16 : index
    %c0_12 = arith.constant 0 : index
    %16 = vector.load %arg4[%c0_11, %c16, %c0_12] : memref<1x48x128xf32, #tpu.memory_space<vmem>>, vector<1x32x128xf32>
    %17 = vector.shape_cast %16 : vector<1x32x128xf32> to vector<32x128xf32>
    %18 = vector.shape_cast %15 : vector<32x128xf32> to vector<1x32x128xf32>
    tpu.vector_store %arg4[%c0_11, %c16, %c0_12], %18 {strides = array<i32>} : memref<1x48x128xf32, #tpu.memory_space<vmem>>, vector<1x32x128xf32>,
    return
  }
  func.func @transform_0(%arg0: i32) -> (i32, i32) {
    %c0_i32 = arith.constant 0 : i32
    %c0_i32_0 = arith.constant 0 : i32
    %c0_i32_1 = arith.constant 0 : i32
    return %c0_i32, %c0_i32_0 : i32, i32
  }
  func.func @transform_1(%arg0: i32) -> (i32, i32) {
    %c0_i32 = arith.constant 0 : i32
    %c0_i32_0 = arith.constant 0 : i32
    %c0_i32_1 = arith.constant 0 : i32
    return %c0_i32, %c0_i32_0 : i32, i32
  }
  func.func @transform_2(%arg0: i32) -> (i32, i32, i32) {
    %c0_i32 = arith.constant 0 : i32
    %c0_i32_0 = arith.constant 0 : i32
    %c0_i32_1 = arith.constant 0 : i32
    return %arg0, %c0_i32, %c0_i32_0 : i32, i32, i32
  }
  func.func @transform_3(%arg0: i32) -> (i32, i32, i32) {
    %c0_i32 = arith.constant 0 : i32
    %c0_i32_0 = arith.constant 0 : i32
    %c0_i32_1 = arith.constant 0 : i32
    return %arg0, %c0_i32, %c0_i32_0 : i32, i32, i32
  }
}

</mosaic_0001>

<bundles_post_ra>
// kernel: simplified_rpe_attention.1
= control target key start
LH: loop header
LB: loop body
LE: loop exit
PB: predicated region body
PF: predicated region fallthrough
CT: control target
= control target key end

     0   :  { %s590_s12 = smov 0   ;;  %s647_s0 = inlined_call_operand.vmem [shape: bf16[32,16], index: 0, kind: input, shape index: {}]   ;;  %s648_s1 = inlined_call_operand.vmem [shape: bf16[128,128], index: 1, kind: input, shape index: {}]   ;;  %s649_s2 = inlined_call_operand.vmem [shape: f32[2,16,128], index: 2, kind: input, shape index: {}]   ;;  %s650_s3 = inlined_call_operand.vmem [shape: f32[2,48,128], index: 3, kind: output, shape index: {}]  }
   0x1 LB: > { %s465_s13 = sadd.s32 4294967295, %s568_s12   ;;  %p469_p0 = scmp.ge.s32.totalorder %s568_s12, 1  ;;  %s568_s12 = sphi %s590_s12, %s13_s12  }
   0x2   : > { %p137_p1 = scmp.lt.s32.totalorder %s568_s12, 3 }
   0x4   : > { %p138_p2 = pnand %p469_p0, %p137_p1 }
   0x5   : > { %p161_p3 = scmp.lt.s32.totalorder (!%p138_p2), %s465_s13, 1  ;;  %v536_v0 = vld [vmem:[%s647_s0] sm:$0xff] (!%p138_p2)   ;;  %vm191_vm0 = vcmask (!%p138_p2), 130048   ;;  %v539_v2 = vld [vmem:[%s648_s1 + $0x8] sm:$0xff] (!%p138_p2)   ;;  %v540_v5 = vld [vmem:[%s648_s1 + $0x10] sm:$0xff] (!%p138_p2)  }
   0x6   : > { %141 = sbr.rel (%p138_p2) target bundleno = 489 (0x1e9), region = 32  ;;  %503 = vmatprep.mubr.msk.bf16.mxu0 (!%p138_p2), %vm191_vm0, %v536_v0  ;;  %v538_v1 = vld [vmem:[%s648_s1] sm:$0xff] (!%p138_p2)   ;;  %v537_v7 = vld [vmem:[%s647_s0 + $0x8] sm:$0xff] (!%p138_p2)   ;;  %v541_v8 = vld [vmem:[%s648_s1 + $0x18] sm:$0xff] (!%p138_p2)  }
   0x7   : > { %507 = vmatprep.subr.bf16.mxu1 (!%p138_p2), %v538_v1  ;;  %v542_v9 = vld [vmem:[%s648_s1 + $0x20] sm:$0xff] (!%p138_p2)   ;;  %v543_v10 = vld [vmem:[%s648_s1 + $0x28] sm:$0xff] (!%p138_p2)   ;;  %v544_v11 = vld [vmem:[%s648_s1 + $0x30] sm:$0xff] (!%p138_p2)  }
   0x8   : > { %508 = vmatpush3.bf16.msra.mxu1 (!%p138_p2), %v538_v1  ;;  %v545_v12 = vld [vmem:[%s648_s1 + $0x38] sm:$0xff] (!%p138_p2)  }
   0x9   : > { %509 = vmatprep.subr.bf16.mxu1 (!%p138_p2), %v539_v2 }
   0xc   : > { %510 = vmatpush3.bf16.msra.mxu1 (!%p138_p2), %v539_v2 }
   0xd   : > { %s652_s13 = smov (!%p161_p3, %s465_s13), 1  ;;  %511 = vmatprep.subr.bf16.mxu1 %v540_v5 }
   0xe   : > { %s487_s20 = sshll.u32 %s652_s13, 4  ;;  %s527_s21 = smul.u32 48, %s652_s13 }
   0xf   : > { %s165_s24 = scalar_lea.vmem %s649_s2, %s487_s20 }
  0x10   : > { %s614_s27 = scalar_lea.vmem %s650_s3, %s527_s21  ;;  %v172_v3 = vld [vmem:[%s165_s24] sm:$0xff]  ;;  %v173_v4 = vld [vmem:[%s165_s24 + $0x8] sm:$0xff]  ;;  %512 = vmatpush3.bf16.msra.mxu1 %v540_v5 }
  0x11   : > { %174 = vst [vmem:[%s614_s27] sm:$0xff] %v172_v3  ;;  %175 = vst [vmem:[%s614_s27 + $0x8] sm:$0xff] %v173_v4  ;;  %v180_v6 = vpack.c.bf16 %v173_v4, %v172_v3  ;;  %513 = vmatprep.subr.bf16.mxu1 %v541_v8 }
  0x13   : > { %501 = vmatprep.subr.bf16.mxu0 %v180_v6 }
  0x14   : > { %502 = vmatpush3.bf16.msra.mxu0 %v180_v6  ;;  %514 = vmatpush3.bf16.msra.mxu1 %v541_v8 }
  0x15   : > { %515 = vmatprep.subr.bf16.mxu1 %v542_v9 }
  0x17   : > { %504 = vmatmul.mubr.msk.bf16.vlgmr.msra.gmra.mrb[0].mxu0 %vm191_vm0, %v537_v7 }
  0x18   : > { %516 = vmatpush3.bf16.msra.mxu1 %v542_v9 }
  0x19   : > { %517 = vmatprep.subr.bf16.mxu1 %v543_v10 }
  0x1c   : > { %518 = vmatpush3.bf16.msra.mxu1 %v543_v10 }
  0x1d   : > { %519 = vmatprep.subr.bf16.mxu1 %v544_v11 }
  0x20   : > { %520 = vmatpush3.bf16.msra.mxu1 %v544_v11 }
  0x21   : > { %521 = vmatprep.subr.bf16.mxu1 %v545_v12 }
  0x24   : > { %522 = vmatpush3.bf16.msra.mxu1 %v545_v12 }
  0xea   : > { %v505_v13 = vpop.f32.mrb[0].mxu0 }
  0xeb   : > { %v232_v14 = vpop.f32.mrb[1].mxu0  ;;  %v249_v16 = vmul.f32 %v505_v13, %v505_v13 }
  0xec   : > { %v506_v15 = vpop.f32.mrb[2].mxu0  ;;  %v247_v19 = vmul.f32 %v232_v14, %v232_v14 }
  0xed   : > { %v250_v17 = vmul.f32 %v506_v15, %v506_v15  ;;  %v235_v18 = vpop.f32.mrb[3].mxu0 }
  0xee   : > { %v248_v20 = vmul.f32 %v235_v18, %v235_v18 }
  0xef   : > { %v252_v21 = vpack.c.bf16 %v250_v17, %v249_v16 }
  0xf0   : > { %v251_v22 = vpack.c.bf16 %v248_v20, %v247_v19 }
  0xf2   : > { %523 = vmatprep.mubr.bf16.mxu1 %v251_v22 }
  0xf3   : > { %524 = vmatmul.mubr.bf16.vlgmr.msra.gmra.mrb[0].mxu1 %v252_v21 }
 0x1c6   : > { %v525_v23 = vpop.f32.mrb[0].mxu1 }
 0x1c7   : > { %546 = vrsqrt.f32 %v525_v23  ;;  %v351_v24 = vpop.f32.mrb[1].mxu1  ;;  %vm382_vm1 = vcmp.eq.f32.partialorder %v525_v23, inf  ;;  %vm384_vm2 = vcmp.eq.f32.partialorder %v525_v23, 0.0  ;;  %v385_v30 = vand.u32 2147483648, %v525_v23 }
 0x1c8   : > { %548 = vrsqrt.f32 %v351_v24  ;;  %v526_v25 = vpop.f32.mrb[2].mxu1  ;;  %vm368_vm3 = vcmp.eq.f32.partialorder %v351_v24, inf  ;;  %vm370_vm4 = vcmp.eq.f32.partialorder %v351_v24, 0.0  ;;  %v371_v33 = vand.u32 2147483648, %v351_v24 }
 0x1c9   : > { %550 = vrsqrt.f32 %v526_v25  ;;  %v354_v26 = vpop.f32.mrb[3].mxu1  ;;  %vm389_vm5 = vcmp.eq.f32.partialorder %v526_v25, inf  ;;  %vm391_vm6 = vcmp.eq.f32.partialorder %v526_v25, 0.0  ;;  %v392_v37 = vand.u32 2147483648, %v526_v25 }
 0x1ca   : > { %552 = vrsqrt.f32 %v354_v26  ;;  %vm375_vm7 = vcmp.eq.f32.partialorder %v354_v26, inf  ;;  %v378_v44 = vand.u32 2147483648, %v354_v26  ;;  %vm377_vm8 = vcmp.eq.f32.partialorder %v354_v26, 0.0 }
 0x1d1   : > { %v547_v27 = vpop.eup %546 }
 0x1d2   : > { %v549_v28 = vpop.eup %548  ;;  %v381_v29 = vmul.f32 %v547_v27, %v525_v23 }
 0x1d3   : > { %v551_v31 = vpop.eup %550  ;;  %v367_v32 = vmul.f32 %v549_v28, %v351_v24 }
 0x1d4   : > { %v553_v34 = vpop.eup %552  ;;  %v383_v35 = vsel %vm382_vm1, %v525_v23, %v381_v29  ;;  %v388_v36 = vmul.f32 %v551_v31, %v526_v25 }
 0x1d5   : > { %v386_v38 = vsel %vm384_vm2, %v385_v30, %v383_v35  ;;  %v369_v39 = vsel %vm368_vm3, %v351_v24, %v367_v32  ;;  %v374_v40 = vmul.f32 %v553_v34, %v354_v26 }
 0x1d6   : > { %v396_v41 = vadd.f32 1e-07, %v386_v38  ;;  %v372_v42 = vsel %vm370_vm4, %v371_v33, %v369_v39  ;;  %v390_v43 = vsel %vm389_vm5, %v526_v25, %v388_v36 }
 0x1d7   : > { %v394_v45 = vadd.f32 1e-07, %v372_v42  ;;  %v393_v46 = vsel %vm391_vm6, %v392_v37, %v390_v43  ;;  %v376_v47 = vsel %vm375_vm7, %v354_v26, %v374_v40 }
 0x1d8   : > { %554 = vrcp.f32 %v396_v41  ;;  %v397_v48 = vadd.f32 1e-07, %v393_v46  ;;  %v379_v49 = vsel %vm377_vm8, %v378_v44, %v376_v47 }
 0x1d9   : > { %556 = vrcp.f32 %v394_v45  ;;  %v395_v50 = vadd.f32 1e-07, %v379_v49 }
 0x1da   : > { %558 = vrcp.f32 %v397_v48 }
 0x1db   : > { %560 = vrcp.f32 %v395_v50 }
 0x1e2   : > { %v555_v51 = vpop.eup %554 }
 0x1e3   : > { %v557_v52 = vpop.eup %556  ;;  %v403_v53 = vmul.f32 %v555_v51, %v505_v13 }
 0x1e4   : > { %v559_v54 = vpop.eup %558  ;;  %v399_v55 = vmul.f32 %v557_v52, %v232_v14 }
 0x1e5   : > { %v561_v56 = vpop.eup %560  ;;  %408 = vst [vmem:[%s614_s27 + $0x20] sm:$0xff] %v403_v53  ;;  %v405_v57 = vmul.f32 %v559_v54, %v506_v15 }
 0x1e6   : > { %406 = vst [vmem:[%s614_s27 + $0x10] sm:$0xff] %v399_v55  ;;  %v401_v58 = vmul.f32 %v561_v56, %v235_v18 }
 0x1e7   : > { %409 = vst [vmem:[%s614_s27 + $0x28] sm:$0xff] %v405_v57 }
 0x1e8   : > { %407 = vst [vmem:[%s614_s27 + $0x18] sm:$0xff] %v401_v58 }
 0x1e9 PF: > { %s13_s12 = sadd.s32 1, %s568_s12  }
 0x1ea   : > { %p10_p4 = scmp.ge.s32.totalorder %s13_s12, 4  }
 0x1ec   :  { %12 = sbr.rel (!%p10_p4) target bundleno = 1 (0x1), region = 62 }

</bundles_post_ra>
